<compile_context>
chip_gen: v7x
topology: tpu7x:2x2x1
jax: 0.10.0
libtpu: 0.0.40
codegen_flags: <defaults>
</compile_context>

<pallas_src>
import functools

import jax
import jax.numpy as jnp
from jax.experimental import pallas as pl
from jax.experimental.pallas import tpu as pltpu


def _pick_tile(n, candidates):
    """Largest candidate that evenly divides n (falls back to n itself)."""
    for c in candidates:
        if n % c == 0:
            return c
    return n


# ----------------------------------------------------------------------------
# Kernel 1: row-tiled per-batch pairwise squared euclidean distances.
# Used for both the logits features (knn_point / e_ij) and the flattened
# ins_T matrices (T_dist).
# ----------------------------------------------------------------------------
def _pairwise_sqdist_kernel(rows_ref, xt_ref, sqall_ref, d_ref):
    # rows_ref : (1, TM, C)   row tile of the points
    # xt_ref   : (1, C, N)    all points, pre-transposed (matmul orientation)
    # sqall_ref: (1, 1, N)    squared norms of all points
    # d_ref    : (1, TM, N)   output distance tile (lane-dense: last dim = N)
    rows = rows_ref[0]                                              # (TM, C)
    xt = xt_ref[0]                                                  # (C, N)
    sq_rows = jnp.sum(rows * rows, axis=-1, keepdims=True)          # (TM, 1)
    gram = jnp.dot(rows, xt, preferred_element_type=jnp.float32)    # (TM, N) MXU
    d = sq_rows + sqall_ref[0] - 2.0 * gram
    # Clamp: matmul-form distances can go slightly negative from cancellation;
    # they feed exp(-d / 2s^2) downstream, so keep them >= 0.
    d_ref[0] = jnp.maximum(d, 0.0)


def pairwise_sqdist(x, *, row_tile=None):
    """x: (B, N, C) float32 -> (B, N, N) float32 squared distances (>= 0)."""
    B, N, C = x.shape
    # TM=256 keeps the double-buffered (TM, N) output block comfortably inside
    # VMEM on all generations (incl. v7x's 64 MiB) while staying near the HBM
    # roofline; shrink automatically for small N.
    tm = row_tile if row_tile is not None else _pick_tile(N, (256, 128, 64, 32, 16, 8))
    xt = jnp.transpose(x, (0, 2, 1))                                # (B, C, N)
    sq = jnp.sum(x * x, axis=-1)[:, None, :]                        # (B, 1, N)
    # TODO(synk): on v6e/v7x the Gram matmul inputs could be cast to bfloat16
    # for 2x MXU/DMA savings; kept f32 here to preserve exact neighbor ordering.
    return pl.pallas_call(
        _pairwise_sqdist_kernel,
        out_shape=jax.ShapeDtypeStruct((B, N, N), jnp.float32),
        grid=(B, N // tm),
        in_specs=[
            pl.BlockSpec((1, tm, C), lambda b, i: (b, i, 0)),
            pl.BlockSpec((1, C, N), lambda b, i: (b, 0, 0)),   # resident per batch
            pl.BlockSpec((1, 1, N), lambda b, i: (b, 0, 0)),   # resident per batch
        ],
        out_specs=pl.BlockSpec((1, tm, N), lambda b, i: (b, i, 0)),
        compiler_params=pltpu.CompilerParams(
            dimension_semantics=("parallel", "parallel"),
            vmem_limit_bytes=64 * 1024 * 1024,
        ),
    )(x, xt, sq)


# ----------------------------------------------------------------------------
# Kernel 2: manifold-loss reduction, tiled over M = B*N with per-tile partials.
# Operands are all small (M, k) / (M, 1) tensors; the heavy (M, k, C) and
# (M, k, nc^2) gathers of v1 have been eliminated.
# ----------------------------------------------------------------------------
def _manifold_loss_kernel(lab_ref, nlab_ref, dnn_ref, dtnn_ref, part_ref,
                          *, inv_two_sigma_sq):
    # lab_ref : (TM, 1) int32, nlab_ref: (TM, k) int32
    # dnn_ref : (TM, k) f32  squared logits-space distance to each neighbor
    # dtnn_ref: (TM, k) f32  squared ins_T-space distance to each neighbor
    sign = jnp.where(lab_ref[...] == nlab_ref[...], 1.0, -1.0)       # (TM, k)
    eij = jnp.exp(-dnn_ref[...] * inv_two_sigma_sq)                   # EUP
    part_ref[0, 0] = jnp.sum(sign * eij * dtnn_ref[...])


def manifold_loss(labels_col, neigh_labels, d_nn, dT_nn, *, sigma, k):
    M = labels_col.shape[0]
    tm = _pick_tile(M, (1024, 512, 256, 128, 64, 32, 16, 8))
    num_tiles = M // tm
    kern = functools.partial(_manifold_loss_kernel,
                             inv_two_sigma_sq=1.0 / (2.0 * sigma * sigma))
    partials = pl.pallas_call(
        kern,
        out_shape=jax.ShapeDtypeStruct((num_tiles, 1), jnp.float32),
        grid=(num_tiles,),
        in_specs=[
            pl.BlockSpec((tm, 1), lambda i: (i, 0)),
            pl.BlockSpec((tm, k), lambda i: (i, 0)),
            pl.BlockSpec((tm, k), lambda i: (i, 0)),
            pl.BlockSpec((tm, k), lambda i: (i, 0)),
        ],
        out_specs=pl.BlockSpec((1, 1), lambda i: (i, 0)),
        compiler_params=pltpu.CompilerParams(
            dimension_semantics=("parallel",),   # independent partials -> megacore on v7x
            vmem_limit_bytes=64 * 1024 * 1024,
        ),
    )(labels_col, neigh_labels, d_nn, dT_nn)
    return jnp.sum(partials) / jnp.float32(M * k)


# ----------------------------------------------------------------------------
# Full forward (mirrors feature_space_loss.forward)
# ----------------------------------------------------------------------------
def feature_space_loss_forward(logits, labels, ins_T, *, k=7, sigma=1.0):
    """logits: (B, C, N) f32, labels: (B, N) int, ins_T: (B*N, nc, nc) f32."""
    B, C, N = logits.shape
    x = jnp.transpose(logits, (0, 2, 1)).astype(jnp.float32)       # (B, N, C)
    t = ins_T.reshape(B, N, -1).astype(jnp.float32)                # (B, N, nc*nc)

    # Pairwise squared distances in logits space (knn_point) and ins_T space
    # (T_dist), both via the same row-tiled Pallas kernel.
    d = pairwise_sqdist(x)                                         # (B, N, N)
    dT = pairwise_sqdist(t)                                        # (B, N, N)

    # TODO(synk): top-(k+1) neighbor selection and the (B, N, k) gathers have
    # no clean Pallas TPU primitive; kept in plain JAX (they are O(N*k) small).
    neg_top, idx = jax.lax.top_k(-d, k + 1)                        # ascending distance
    idx = idx[:, :, 1:]                                            # drop self, (B, N, k)
    d_nn = -neg_top[:, :, 1:]                                      # (B, N, k), >= 0 (clamped in kernel)

    dT_nn = jnp.take_along_axis(dT, idx, axis=2)                   # (B, N, k)
    labels_i32 = labels.astype(jnp.int32)
    neigh_labels = jax.vmap(lambda lab_b, idx_b: lab_b[idx_b])(labels_i32, idx)  # (B, N, k)

    M = B * N
    return manifold_loss(
        labels_i32.reshape(M, 1),
        neigh_labels.reshape(M, k),
        d_nn.reshape(M, k),
        dT_nn.reshape(M, k),
        sigma=sigma, k=k)


# ----------------------------------------------------------------------------
# Pure-JAX reference (faithful to the PyTorch module: direct-diff e_ij / T_dist)
# ----------------------------------------------------------------------------
def reference_loss(logits, labels, ins_T, *, k=7, sigma=1.0):
    B, C, N = logits.shape
    x = jnp.transpose(logits, (0, 2, 1)).astype(jnp.float32)
    sq = jnp.sum(x * x, axis=-1)
    d = sq[:, :, None] + sq[:, None, :] - 2.0 * jnp.einsum('bnc,bmc->bnm', x, x)
    _, idx = jax.lax.top_k(-d, k + 1)
    idx = idx[:, :, 1:]
    flat_idx = (idx + jnp.arange(B, dtype=idx.dtype)[:, None, None] * N).reshape(-1)
    lf = x.reshape(B * N, C)
    lab = labels.reshape(-1).astype(jnp.int32)
    tf = ins_T.reshape(B * N, -1).astype(jnp.float32)
    nl = lf[flat_idx].reshape(B * N, k, C)
    nlab = lab[flat_idx].reshape(B * N, k)
    nt = tf[flat_idx].reshape(B * N, k, -1)
    eij = jnp.exp(-jnp.sum((lf[:, None, :] - nl) ** 2, -1) / (2.0 * sigma ** 2))
    dmap = jnp.where(lab[:, None] == nlab, 1.0, -1.0) * eij
    tdist = jnp.sum((tf[:, None, :] - nt) ** 2, -1)
    return jnp.mean(dmap * tdist)


if __name__ == "__main__":
    # Small shapes consistent with the module: k=7 neighbors, feature dim =
    # num_classes = 8, B=2 scenes, N=64 points each, ins_T: (B*N, 8, 8).
    k, sigma, num_classes = 7, 1.0, 8
    B, N, C = 2, 64, num_classes

    key = jax.random.PRNGKey(0)
    k1, k2, k3 = jax.random.split(key, 3)
    logits = jax.random.normal(k1, (B, C, N), dtype=jnp.float32)      # NCL (channels-first)
    labels = jax.random.randint(k2, (B, N), 0, num_classes, dtype=jnp.int32)
    ins_T = jax.random.normal(k3, (B * N, num_classes, num_classes), dtype=jnp.float32)

    loss = feature_space_loss_forward(logits, labels, ins_T, k=k, sigma=sigma)
    loss = jax.block_until_ready(loss)

    ref = reference_loss(logits, labels, ins_T, k=k, sigma=sigma)
    assert jnp.isfinite(loss), "loss is not finite"
    assert jnp.allclose(loss, ref, rtol=1e-3, atol=1e-3), (loss, ref)

    print("KERNEL_OK")
</pallas_src>

<mosaic_0001>
module attributes {stable_mosaic.version = 11 : i64} {
  func.func @_pairwise_sqdist_kernel(%arg0: i32, %arg1: i32, %arg2: memref<1x64x8xf32, #tpu.memory_space<vmem>>, %arg3: memref<1x8x64xf32, #tpu.memory_space<vmem>>, %arg4: memref<1x1x64xf32, #tpu.memory_space<vmem>>, %arg5: memref<1x64x64xf32, #tpu.memory_space<vmem>>) attributes {dimension_semantics = [#tpu.dimension_semantics<parallel>, #tpu.dimension_semantics<parallel>], iteration_bounds = array<i64: 2, 1>, scalar_prefetch = 0 : i64, scratch_operands = 0 : i64, tpu.core_type = #tpu.core_type<tc>, window_params = [{transform_indices = @transform_0, window_bounds = array<i64: 1, 64, 8>}, {transform_indices = @transform_1, window_bounds = array<i64: 1, 8, 64>}, {transform_indices = @transform_2, window_bounds = array<i64: 1, 1, 64>}, {transform_indices = @transform_3, window_bounds = array<i64: 1, 64, 64>}]} {
    %c0 = arith.constant 0 : index
    %c0_0 = arith.constant 0 : index
    %c0_1 = arith.constant 0 : index
    %0 = vector.load %arg2[%c0, %c0_0, %c0_1] : memref<1x64x8xf32, #tpu.memory_space<vmem>>, vector<1x64x8xf32>
    %1 = vector.shape_cast %0 : vector<1x64x8xf32> to vector<64x8xf32>
    %c0_2 = arith.constant 0 : index
    %c0_3 = arith.constant 0 : index
    %c0_4 = arith.constant 0 : index
    %2 = vector.load %arg3[%c0_2, %c0_3, %c0_4] : memref<1x8x64xf32, #tpu.memory_space<vmem>>, vector<1x8x64xf32>
    %3 = vector.shape_cast %2 : vector<1x8x64xf32> to vector<8x64xf32>
    %4 = arith.mulf %1, %1 : vector<64x8xf32>
    %cst = arith.constant dense<0.000000e+00> : vector<64xf32>
    %5 = vector.multi_reduction <add>, %4, %cst [1] : vector<64x8xf32> to vector<64xf32>
    %6 = vector.shape_cast %5 : vector<64xf32> to vector<64x1xf32>
    %cst_5 = arith.constant dense<0.000000e+00> : vector<64x64xf32>
    %7 = tpu.matmul %1, %3, %cst_5 {dimension_numbers = #tpu.dot_dimension_numbers<[1], [0], [0], [1], [0, 0, 1, 1], [], []>} : vector<64x8xf32>, vector<8x64xf32>, vector<64x64xf32> -> vector<64x64xf32>
    %c0_6 = arith.constant 0 : index
    %c0_7 = arith.constant 0 : index
    %c0_8 = arith.constant 0 : index
    %8 = vector.load %arg4[%c0_6, %c0_7, %c0_8] : memref<1x1x64xf32, #tpu.memory_space<vmem>>, vector<1x1x64xf32>
    %9 = vector.shape_cast %8 : vector<1x1x64xf32> to vector<1x64xf32>
    %10 = vector.broadcast %6 : vector<64x1xf32> to vector<64x64xf32>
    %11 = vector.broadcast %9 : vector<1x64xf32> to vector<64x64xf32>
    %12 = arith.addf %10, %11 : vector<64x64xf32>
    %cst_9 = arith.constant 2.000000e+00 : f32
    %13 = vector.broadcast %cst_9 : f32 to vector<64x64xf32>
    %14 = arith.mulf %13, %7 : vector<64x64xf32>
    %15 = arith.subf %12, %14 : vector<64x64xf32>
    %cst_10 = arith.constant 0.000000e+00 : f32
    %16 = vector.broadcast %cst_10 : f32 to vector<64x64xf32>
    %17 = arith.maximumf %15, %16 : vector<64x64xf32>
    %c0_11 = arith.constant 0 : index
    %c0_12 = arith.constant 0 : index
    %c0_13 = arith.constant 0 : index
    %18 = vector.load %arg5[%c0_11, %c0_12, %c0_13] : memref<1x64x64xf32, #tpu.memory_space<vmem>>, vector<1x64x64xf32>
    %19 = vector.shape_cast %18 : vector<1x64x64xf32> to vector<64x64xf32>
    %20 = vector.shape_cast %17 : vector<64x64xf32> to vector<1x64x64xf32>
    tpu.vector_store %arg5[%c0_11, %c0_12, %c0_13], %20 {strides = array<i32>} : memref<1x64x64xf32, #tpu.memory_space<vmem>>, vector<1x64x64xf32>,
    return
  }
  func.func @transform_0(%arg0: i32, %arg1: i32) -> (i32, i32, i32) {
    %c0_i32 = arith.constant 0 : i32
    %c0_i32_0 = arith.constant 0 : i32
    return %arg0, %arg1, %c0_i32 : i32, i32, i32
  }
  func.func @transform_1(%arg0: i32, %arg1: i32) -> (i32, i32, i32) {
    %c0_i32 = arith.constant 0 : i32
    %c0_i32_0 = arith.constant 0 : i32
    %c0_i32_1 = arith.constant 0 : i32
    return %arg0, %c0_i32, %c0_i32_0 : i32, i32, i32
  }
  func.func @transform_2(%arg0: i32, %arg1: i32) -> (i32, i32, i32) {
    %c0_i32 = arith.constant 0 : i32
    %c0_i32_0 = arith.constant 0 : i32
    %c0_i32_1 = arith.constant 0 : i32
    return %arg0, %c0_i32, %c0_i32_0 : i32, i32, i32
  }
  func.func @transform_3(%arg0: i32, %arg1: i32) -> (i32, i32, i32) {
    %c0_i32 = arith.constant 0 : i32
    %c0_i32_0 = arith.constant 0 : i32
    return %arg0, %arg1, %c0_i32 : i32, i32, i32
  }
}

</mosaic_0001>

<bundles_post_ra>
// kernel: tpu_custom_call.1
= control target key start
LH: loop header
LB: loop body
LE: loop exit
PB: predicated region body
PF: predicated region fallthrough
CT: control target
= control target key end

     0   :  { %s1272_s0 = inlined_call_operand.hbm [shape: f32[2,64,8], index: 0, kind: input, shape index: {}]   ;;  %s1273_s1 = inlined_call_operand.hbm [shape: f32[2,8,64], index: 1, kind: input, shape index: {}]   ;;  %s1274_s2 = inlined_call_operand.hbm [shape: f32[2,1,64], index: 2, kind: input, shape index: {}]   ;;  %s1275_s3 = inlined_call_operand.hbm [shape: f32[2,64,64], index: 3, kind: output, shape index: {}]  }
   0x1   :  { %1280 = sst [smem:[#allocation13_spill]] %s1272_s0 }
   0x2   :  { %1281 = sst [smem:[#allocation14_spill]] %s1273_s1 }
   0x3   :  { %8 = vsyncpa [#allocation3], 0 }
   0x4   :  { %10 = vsyncpa [#allocation3 + $0x1], 0 }
   0x5   :  { %11 = vsyncpa [#allocation6], 0 }
   0x6   :  { %13 = vsyncpa [#allocation6 + $0x1], 0 }
   0x7   :  { %14 = vsyncpa [#allocation4], 0 }
   0x8   :  { %16 = vsyncpa [#allocation4 + $0x1], 0  ;;  %s976_s12 = smov 0   ;;  %s978_s13 = smov 0  }
   0x9   :  { %s980_s14 = smov 0   ;;  %s982_s15 = smov 0  }
   0xa   :  { %s984_s16 = smov 0   ;;  %s986_s17 = smov 0  }
   0xb LB: > { %s1007_s18 = sadd.s32 4294967295, %s946_s17   ;;  %s640_s19 = sadd.s32 4294967294, %s946_s17   ;;  %s946_s17 = sphi %s986_s17, %s22_s17   ;;  %s942_s16 = sphi %s984_s16, %s1305_s16   ;;  %s938_s15 = sphi %s982_s15, %s1304_s15   ;;  %s934_s14 = sphi %s980_s14, %s1303_s14   ;;  %s930_s13 = sphi %s978_s13, %s1302_s13   ;;  %s926_s12 = sphi %s976_s12, %s1301_s12  }
   0xc   : > { %s34_s20 = sadd.s32 1, %s942_s16  ;;  %s43_s21 = sadd.s32 1, %s934_s14 }
   0xd   : > { %p36_p0 = scmp.ge.s32.totalorder %s34_s20, 2  ;;  %p50_p1 = scmp.ne.s32.totalorder %s934_s14, %s930_s13 }
   0xe   : > { %p51_p2 = scmp.eq.s32.totalorder %s946_s17, 0  ;;  %p56_p3 = scmp.ne.s32.totalorder %s930_s13, %s926_s12 }
   0xf   : > { %s1307_s20 = smov (%p36_p0, %s34_s20), 0  ;;  %p57_p5 = scmp.eq.s32.totalorder %s1007_s18, 0 }
  0x10   : > { %1282 = sst [smem:[#allocation12_spill]] %s1307_s20  ;;  %p1019_p4 = por %p51_p2, %p50_p1 }
  0x11   : > { %s38_s23 = ssub.s32 %s942_s16, %s1307_s20  ;;  %p134_p6 = scmp.eq.s32.totalorder %s1007_s18, 1 }
  0x12   : > { %p41_p7 = scmp.eq.s32.totalorder %s38_s23, 0  ;;  %p1027_p8 = por %p57_p5, %p56_p3 }
  0x13   : > { %p1031_p9 = por %p134_p6, %p50_p1  ;;  %p140_p10 = scmp.eq.s32.totalorder %s640_s19, 1 }
  0x14   : > { %s1284_s24 = scalar_select %p1027_p8, 1, 0 }
  0x15   : > { %s1285_s25 = scalar_select %p1031_p9, 1, 0 }
  0x16   : > { %s1036_s26 = scalar_select %p41_p7, %s934_s14, %s43_s21  }
  0x17   : > { %p1038_p11 = por %p140_p10, %p56_p3  ;;  %p716_p13 = scmp.lt.s32.totalorder %s946_s17, 2 }
  0x18   : > { %s1045_s28 = sand.u32 1, %s934_s14   ;;  %s183_s29 = sand.u32 1, %s946_s17  }
  0x19   : > { %s1286_s27 = scalar_select %p1038_p11, 1, 0 }
  0x1a   : > { %s646_s30 = sshll.u32 %s1045_s28, 3  ;;  %p1051_p0 = pnand %p716_p13, %p1019_p4 }
  0x1b   : > { %s647_s5 = sshll.u32 %s942_s16, 7  ;;  %s1288_s1 = sld [smem:[#allocation14_spill]] }
  0x1c   : > { %s1287_s4 = scalar_select %p1051_p0, 1, 0 }
  0x1d   : > { %s187_s9 = scalar_lea.vmem [#allocation5], %s646_s30  ;;  %s1065_s11 = scalar_lea.sflag [#allocation6], %s183_s29 }
  0x1e   : > { %s194_s10 = sshll.u32 %s187_s9, 4  ;;  %p1071_p4 = pneg %p1051_p0  ;;  %s1062_s10 = int_to_ptr.vmem [resolvable:$true] %s194_s10 }
  0x21   : > { %s1059_s8 = scalar_lea.hbm %s1288_s1, %s647_s5  ;;  %s775_s30 = scalar_lea.hbm %s1288_s1, 256 }
  0x22   : > { %s770_s19 = scalar_lea.hbm %s1059_s8, 128  ;;  %p776_p7 = scmp.lt.u32.totalorder %s1059_s8, %s1288_s1 }
  0x23   : > { %p771_p3 = scmp.ne.s32.totalorder %s1059_s8, %s770_s19  ;;  %p777_p10 = scmp.lt.u32.totalorder %s775_s30, %s770_s19 }
  0x24   : > { %p779_p12 = scmp.lt.u32.totalorder %s770_s19, %s1059_s8 }
  0x25   : > { %p773_p5 = pnand %p1071_p4, %p771_p3  ;;  %p778_p13 = por %p777_p10, %p776_p7 }
  0x27   : > { %p774_p6 = pneg %p773_p5  ;;  %p780_p1 = por %p779_p12, %p778_p13 }
  0x29   : > { %p781_p2 = pnand %p780_p1, %p774_p6 }
  0x2b   : > { %784 = shalt.err (!%p781_p2)
}
  0x2c   : > { %s785_s29 = scalar_lea.vmem %s1062_s10, 128  ;;  %s948_s7 = smov [#allocation5]  }
  0x2d   : > { %p786_p3 = scmp.ne.s32.totalorder %s1062_s10, %s785_s29  ;;  %s790_s9 = sshll.u32 %s948_s7, 4  ;;  %s791_s9 = int_to_ptr.vmem [resolvable:$false] %s790_s9 }
  0x2e   : > { %s792_s22 = scalar_lea.vmem %s791_s9, 256  ;;  %p793_p9 = scmp.lt.s32.totalorder %s1062_s10, %s791_s9 }
  0x2f   : > { %p788_p5 = pnand %p786_p3, %p1071_p4  ;;  %p794_p8 = scmp.lt.s32.totalorder %s792_s22, %s785_s29 }
  0x31   : > { %p789_p11 = pneg %p788_p5  ;;  %p795_p7 = por %p794_p8, %p793_p9 }
  0x33   : > { %p796_p10 = pnand %p795_p7, %p789_p11 }
  0x35   : > { %799 = shalt.err (!%p796_p10)
}
  0x36   : > { %708 = dma.hbm_to_vmem [thread:$0]  (!%p1051_p0), %s1059_s8, 128, %s1062_s10, %s1065_s11  }
  0x37   : > { %p1290_p12 = scmp.lt.s32.totalorder %s946_s17, 3  ;;  %p1291_p1 = scmp.ge.s32.totalorder %s946_s17, 1 }
  0x38   : > { %s643_s23 = sshll.u32 %s1045_s28, 6  ;;  %s667_s30 = sshll.u32 %s942_s16, 10 }
  0x39   : > { %p1099_p2 = pnand %p1291_p1, %p1290_p12  ;;  %s1293_s0 = sld [smem:[#allocation13_spill]] }
  0x3a   : > { %s164_s7 = scalar_lea.vmem [#allocation2], %s643_s23  ;;  %s161_s8 = scalar_lea.sflag [#allocation3], %s1045_s28 }
  0x3b   : > { %s1292_s19 = scalar_select %p1099_p2, 1, 0 }
  0x3c   : > { %s173_s9 = sshll.u32 %s164_s7, 4  ;;  %s1110_s9 = int_to_ptr.vmem [resolvable:$true] %s173_s9 }
  0x3f   : > { %s1108_s29 = scalar_lea.hbm %s1293_s0, %s667_s30  ;;  %s805_s5 = scalar_lea.hbm %s1293_s0, 2048 }
  0x40   : > { %s800_s10 = scalar_lea.hbm %s1108_s29, 1024  ;;  %p806_p6 = scmp.lt.u32.totalorder %s1108_s29, %s1293_s0 }
  0x41   : > { %p801_p8 = scmp.ne.s32.totalorder %s1108_s29, %s800_s10  ;;  %p807_p13 = scmp.lt.u32.totalorder %s805_s5, %s800_s10 }
  0x42   : > { %p809_p5 = scmp.lt.u32.totalorder %s800_s10, %s1108_s29 }
  0x43   : > { %p803_p9 = pnand %p801_p8, %p1071_p4  ;;  %p808_p3 = por %p807_p13, %p806_p6 }
  0x45   : > { %p804_p11 = pneg %p803_p9  ;;  %p810_p7 = por %p809_p5, %p808_p3 }
  0x47   : > { %p811_p10 = pnand %p810_p7, %p804_p11 }
  0x49   : > { %814 = shalt.err (!%p811_p10)
}
  0x4a   : > { %s815_s23 = scalar_lea.vmem %s1110_s9, 1024  ;;  %s949_s1 = smov [#allocation2]  }
  0x4b   : > { %p816_p12 = scmp.ne.s32.totalorder %s1110_s9, %s815_s23  ;;  %s820_s7 = sshll.u32 %s949_s1, 4  ;;  %s821_s7 = int_to_ptr.vmem [resolvable:$false] %s820_s7 }
  0x4c   : > { %s822_s22 = scalar_lea.vmem %s821_s7, 2048  ;;  %p823_p9 = scmp.lt.s32.totalorder %s1110_s9, %s821_s7 }
  0x4d   : > { %p818_p1 = pnand %p816_p12, %p1071_p4  ;;  %p824_p2 = scmp.lt.s32.totalorder %s822_s22, %s815_s23 }
  0x4f   : > { %p819_p8 = pneg %p818_p1  ;;  %p825_p6 = por %p824_p2, %p823_p9 }
  0x51   : > { %p826_p13 = pnand %p825_p6, %p819_p8 }
  0x53   : > { %829 = shalt.err (!%p826_p13)
}
  0x54   : > { %s950_s10 = smov 128   ;;  %s951_s5 = smov 8  }
  0x55   : > { %705 = dma.hbm_to_vmem [thread:$0]  (!%p1051_p0), %s1108_s29, 1024, %s1110_s9, %s161_s8, %s950_s10, %s950_s10, %s951_s5  }
  0x56   : > { %s648_s30 = sshll.u32 %s942_s16, 4  ;;  %s204_s7 = scalar_lea.vmem [#allocation7], %s1045_s28 }
  0x57   : > { %s1140_s23 = scalar_lea.hbm %s1274_s2, %s648_s30  ;;  %s211_s22 = sshll.u32 %s204_s7, 4  ;;  %s212_s22 = int_to_ptr.vmem [resolvable:$true] %s211_s22 }
  0x58   : > { %s830_s0 = scalar_lea.hbm %s1140_s23, 16  ;;  %s835_s9 = scalar_lea.hbm %s1274_s2, 32 }
  0x59   : > { %p831_p2 = scmp.ne.s32.totalorder %s1140_s23, %s830_s0  ;;  %p836_p5 = scmp.lt.u32.totalorder %s1140_s23, %s1274_s2 }
  0x5a   : > { %p837_p7 = scmp.lt.u32.totalorder %s835_s9, %s830_s0  ;;  %p839_p12 = scmp.lt.u32.totalorder %s830_s0, %s1140_s23 }
  0x5b   : > { %p833_p11 = pnand %p831_p2, %p1071_p4 }
  0x5c   : > { %p838_p10 = por %p837_p7, %p836_p5 }
  0x5d   : > { %p834_p3 = pneg %p833_p11 }
  0x5e   : > { %p840_p1 = por %p839_p12, %p838_p10 }
  0x60   : > { %p841_p8 = pnand %p840_p1, %p834_p3 }
  0x62   : > { %844 = shalt.err (!%p841_p8)
}
  0x63   : > { %s845_s28 = scalar_lea.vmem %s212_s22, 16  ;;  %s952_s5 = smov [#allocation7]  }
  0x64   : > { %p846_p9 = scmp.ne.s32.totalorder %s212_s22, %s845_s28  ;;  %s850_s30 = sshll.u32 %s952_s5, 4  ;;  %s851_s30 = int_to_ptr.vmem [resolvable:$false] %s850_s30 }
  0x65   : > { %s852_s20 = scalar_lea.vmem %s851_s30, 32  ;;  %p853_p2 = scmp.lt.s32.totalorder %s212_s22, %s851_s30 }
  0x66   : > { %p848_p6 = pnand %p846_p9, %p1071_p4  ;;  %p854_p11 = scmp.lt.s32.totalorder %s852_s20, %s845_s28 }
  0x68   : > { %p849_p13 = pneg %p848_p6  ;;  %p855_p0 = por %p854_p11, %p853_p2 }
  0x6a   : > { %p856_p5 = pnand %p855_p0, %p849_p13 }
  0x6c   : > { %859 = shalt.err (!%p856_p5)
}
  0x6d   : > { %p1294_p7 = scmp.ne.s32.totalorder %s1287_s4, 0  ;;  %p1295_p3 = scmp.ne.s32.totalorder %s1292_s19, 0 }
  0x6e   : > { %s1164_s0 = sand.u32 (!%p1295_p3), 1, %s930_s13   ;;  %p1296_p0 = scmp.ne.s32.totalorder (!%p1295_p3), %s1284_s24, 0 }
  0x6f   : > { %711 = dma.hbm_to_vmem [thread:$0]  (!%p1294_p7), %s1140_s23, 16, %s212_s22, %s1065_s11  }
  0x70   : > { %220 = sbr.rel (%p1295_p3) target bundleno = 365 (0x16d), region = 32  ;;  %s650_s21 = sshll.u32 (!%p1295_p3), %s1164_s0, 6 }
  0x71   : > { %s223_s6 = scalar_lea.sflag (!%p1295_p3), [#allocation3], %s1164_s0  ;;  %s1170_s1 = scalar_lea.vmem (!%p1295_p3), [#allocation2], %s650_s21 }
  0x77   : > { %913 = dma.done.wait (%p1296_p0), %s223_s6, 1024  }
  0x78   : > { %915 = vsyncadd (%p1296_p0), %s223_s6, 4294966272  ;;  %s231_s4 = sand.u32 1, %s1007_s18   ;;  %s651_s11 = sshll.u32 %s1164_s0, 3 }
  0x79   : > { %s232_s19 = scalar_lea.sflag [#allocation6], %s231_s4  ;;  %s235_s23 = scalar_lea.vmem [#allocation5], %s651_s11 }
  0x7a   : > { %917 = dma.done.wait (%p1296_p0), %s232_s19, 144  }
  0x7b   : > { %919 = vsyncadd (%p1296_p0), %s232_s19, 4294967152  ;;  %v285_v0 = vld [vmem:[%s235_s23] sm:$0xff]  ;;  %vm294_vm0 = vcmask 64512   ;;  %v279_v6 = vld [vmem:[%s1170_s1 + $0x10] sm:$0xff]  ;;  %s243_s18 = scalar_lea.vmem [#allocation7], %s1164_s0  ;;  %vm487_vm1 = vcmask 523264  }
  0x7c   : > { %v277_v1 = vld [vmem:[%s1170_s1] sm:$0xff]  ;;  %678 = vmatprep.subr.mxu0 %v285_v0  ;;  %692 = vmatprep.subr.mxu1 %v285_v0  ;;  %v278_v4 = vld [vmem:[%s1170_s1 + $0x8] sm:$0xff]  ;;  %v283_v7 = vld [vmem:[%s1170_s1 + $0x30] sm:$0xff]  ;;  %v288_v9 = vmul.f32 %v279_v6, %v279_v6  ;;  %s668_s24 = sshll.u32 %s938_s15, 10  ;;  %s274_s7 = scalar_lea.vmem [#allocation8], %s650_s21 }
  0x7d   : > { %v281_v2 = vld [vmem:[%s1170_s1 + $0x20] sm:$0xff]  ;;  %v286_v3 = vmul.f32 %v277_v1, %v277_v1  ;;  %v282_v5 = vld [vmem:[%s1170_s1 + $0x28] sm:$0xff]  ;;  %679 = vmatpush3.msra.mxu0 %v285_v0  ;;  %693 = vmatpush3.msra.mxu1 %v285_v0  ;;  %v280_v8 = vld [vmem:[%s1170_s1 + $0x18] sm:$0xff]  ;;  %v287_v12 = vmul.f32 %v278_v4, %v278_v4  ;;  %v292_v22 = vmul.f32 %v283_v7, %v283_v7  ;;  %s512_s22 = sshll.u32 %s274_s7, 4  ;;  %s1217_s9 = scalar_lea.hbm %s1275_s3, %s668_s24  ;;  %s1219_s22 = int_to_ptr.vmem [resolvable:$true] %s512_s22 }
  0x7e   : > { %680 = vmatprep.mubr.msk.f32.mxu0 %vm294_vm0, %v277_v1  ;;  %686 = vmatprep.mubr.msk.f32.mxu1 %vm294_vm0, %v281_v2  ;;  %v289_v11 = vmul.f32 %v280_v8, %v280_v8  ;;  %v301_v13 = vsel %vm294_vm0, %v288_v9, 0.0  ;;  %v284_v14 = vld [vmem:[%s1170_s1 + $0x38] sm:$0xff]  ;;  %v290_v15 = vmul.f32 %v281_v2, %v281_v2  ;;  %v291_v18 = vmul.f32 %v282_v5, %v282_v5  ;;  %v661_v31 = vld [vmem:[%s243_s18] ss:$0 sm:$0xff]  ;;  %s497_s8 = scalar_lea.sflag [#allocation4], %s1164_s0  ;;  %s860_s10 = scalar_lea.vmem %s1219_s22, 1024 }
  0x7f   : > { %v295_v10 = vsel %vm294_vm0, %v286_v3, 0.0  ;;  %681 = vmatmul.mubr.msk.f32.vlgmr.msra.gmra.mrb[0].mxu0 %vm294_vm0, %v278_v4  ;;  %687 = vmatmul.mubr.msk.f32.vlgmr.msra.gmra.mrb[0].mxu1 %vm294_vm0, %v282_v5  ;;  %v298_v17 = vsel %vm294_vm0, %v287_v12, 0.0  ;;  %v293_v21 = vmul.f32 %v284_v14, %v284_v14  ;;  %v313_v24 = vsel %vm294_vm0, %v292_v22, 0.0  ;;  %p861_p4 = scmp.ne.s32.totalorder %s1219_s22, %s860_s10  ;;  %p1297_p10 = scmp.ne.s32.totalorder %s1285_s25, 0 }
  0x80   : > { %683 = vmatprep.mubr.msk.f32.mxu0 %vm294_vm0, %v279_v6  ;;  %689 = vmatprep.mubr.msk.f32.mxu1 %vm294_vm0, %v283_v7  ;;  %v304_v16 = vsel %vm294_vm0, %v289_v11, 0.0  ;;  %v310_v19 = vsel %vm294_vm0, %v291_v18, 0.0  ;;  %v307_v20 = vsel %vm294_vm0, %v290_v15, 0.0  ;;  %s953_s28 = smov [#allocation8]  }
  0x81   : > { %302 = vadd.xlane.f32.xlu1 %v301_v13  ;;  %296 = vadd.xlane.f32.xlu0 %v295_v10  ;;  %v316_v23 = vsel %vm294_vm0, %v293_v21, 0.0  ;;  %p862_p12 = pnand %p861_p4, %p1297_p10  ;;  %s864_s5 = sshll.u32 %s953_s28, 4  ;;  %s865_s5 = int_to_ptr.vmem [resolvable:$false] %s864_s5 }
  0x82   : > { %s866_s30 = scalar_lea.vmem %s865_s5, 2048  ;;  %p867_p8 = scmp.lt.s32.totalorder %s1219_s22, %s865_s5 }
  0x83   : > { %684 = vmatmul.mubr.msk.f32.gmra.mrb[2].mxu0 %vm294_vm0, %v280_v8  ;;  %690 = vmatmul.mubr.msk.f32.gmra.mrb[2].mxu1 %vm294_vm0, %v284_v14  ;;  %p863_p1 = pneg %p862_p12  ;;  %p868_p9 = scmp.lt.s32.totalorder %s866_s30, %s860_s10 }
  0x85   : > { %305 = vadd.xlane.f32.xlu1 %v304_v16  ;;  %299 = vadd.xlane.f32.xlu0 %v298_v17  ;;  %p869_p6 = por %p868_p9, %p867_p8 }
  0x87   : > { %p870_p13 = pnand %p869_p6, %p863_p1 }
  0x89   : > { %311 = vadd.xlane.f32.xlu1 %v310_v19  ;;  %308 = vadd.xlane.f32.xlu0 %v307_v20 }
  0x8d   : > { %317 = vadd.xlane.f32.xlu1 %v316_v23  ;;  %314 = vadd.xlane.f32.xlu0 %v313_v24 }
 0x10e   : > { %v303_v25 = vpop.xlane.xlu1 %302  ;;  %v297_v26 = vpop.xlane.xlu0 %296 }
 0x10f   : > { %v455_v43 = vadd.f32 %v661_v31, %v297_v26  ;;  %v457_v46 = vadd.f32 %v661_v31, %v303_v25 }
 0x112   : > { %v306_v27 = vpop.xlane.xlu1 %305  ;;  %v300_v28 = vpop.xlane.xlu0 %299 }
 0x113   : > { %v456_v38 = vadd.f32 %v661_v31, %v300_v28  ;;  %v458_v50 = vadd.f32 %v661_v31, %v306_v27 }
 0x116   : > { %v312_v29 = vpop.xlane.xlu1 %311  ;;  %v309_v30 = vpop.xlane.xlu0 %308 }
 0x117   : > { %v460_v32 = vadd.f32 %v661_v31, %v312_v29  ;;  %v459_v37 = vadd.f32 %v661_v31, %v309_v30 }
 0x11a   : > { %v318_v33 = vpop.xlane.xlu1 %317  ;;  %v315_v34 = vpop.xlane.xlu0 %314 }
 0x11b   : > { %v462_v49 = vadd.f32 %v661_v31, %v318_v33  ;;  %v461_v55 = vadd.f32 %v661_v31, %v315_v34 }
 0x152   : > { %v688_v35 = vpop.f32.mrb[0].mxu1  ;;  %v682_v36 = vpop.f32.mrb[0].mxu0 }
 0x153   : > { %v468_v39 = vmul.f32 2.0, %v688_v35  ;;  %v464_v40 = vmul.f32 2.0, %v682_v36  ;;  %v409_v41 = vpop.f32.mrb[1].mxu0  ;;  %v429_v42 = vpop.f32.mrb[1].mxu1 }
 0x154   : > { %v463_v44 = vmul.f32 2.0, %v409_v41  ;;  %v467_v45 = vmul.f32 2.0, %v429_v42 }
 0x155   : > { %v476_v47 = vsub.f32 %v460_v32, %v468_v39  ;;  %v472_v48 = vsub.f32 %v456_v38, %v464_v40 }
 0x156   : > { %v471_v51 = vsub.f32 %v455_v43, %v463_v44  ;;  %v475_v52 = vsub.f32 %v459_v37, %v467_v45  ;;  %v691_v53 = vpop.f32.mrb[2].mxu1  ;;  %v685_v54 = vpop.f32.mrb[2].mxu0 }
 0x157   : > { %v484_v56 = vmax.f32 %v476_v47, 0.0  ;;  %v480_v57 = vmax.f32 %v472_v48, 0.0  ;;  %v470_v58 = vmul.f32 2.0, %v691_v53  ;;  %v466_v59 = vmul.f32 2.0, %v685_v54  ;;  %v419_v60 = vpop.f32.mrb[3].mxu0  ;;  %v439_v61 = vpop.f32.mrb[3].mxu1 }
 0x158   : > { %v479_v62 = vmax.f32 %v471_v51, 0.0  ;;  %v483_v63 = vmax.f32 %v475_v52, 0.0  ;;  %v465_v0 = vmul.f32 2.0, %v419_v60  ;;  %v469_v1 = vmul.f32 2.0, %v439_v61 }
 0x159   : > { %493 = vst.msk [vmem:[%s274_s7 + $0x28] sm:$0xff] %vm487_vm1, %v484_v56  ;;  %489 = vst.msk [vmem:[%s274_s7 + $0x8] sm:$0xff] %vm487_vm1, %v480_v57  ;;  %v478_v2 = vsub.f32 %v462_v49, %v470_v58  ;;  %v474_v3 = vsub.f32 %v458_v50, %v466_v59 }
 0x15a   : > { %488 = vst.msk [vmem:[%s274_s7] sm:$0xff] %vm487_vm1, %v479_v62  ;;  %492 = vst.msk [vmem:[%s274_s7 + $0x20] sm:$0xff] %vm487_vm1, %v483_v63  ;;  %v473_v4 = vsub.f32 %v457_v46, %v465_v0  ;;  %v477_v5 = vsub.f32 %v461_v55, %v469_v1 }
 0x15b   : > { %v486_v6 = vmax.f32 %v478_v2, 0.0  ;;  %v482_v7 = vmax.f32 %v474_v3, 0.0 }
 0x15c   : > { %v481_v8 = vmax.f32 %v473_v4, 0.0  ;;  %v485_v9 = vmax.f32 %v477_v5, 0.0 }
 0x15d   : > { %495 = vst.msk [vmem:[%s274_s7 + $0x38] sm:$0xff] %vm487_vm1, %v486_v6  ;;  %491 = vst.msk [vmem:[%s274_s7 + $0x18] sm:$0xff] %vm487_vm1, %v482_v7 }
 0x15e   : > { %490 = vst.msk [vmem:[%s274_s7 + $0x10] sm:$0xff] %vm487_vm1, %v481_v8  ;;  %494 = vst.msk [vmem:[%s274_s7 + $0x30] sm:$0xff] %vm487_vm1, %v485_v9 }
 0x15f   : > { %873 = shalt.err (!%p870_p13)
}
 0x160   : > { %s874_s20 = scalar_lea.hbm %s1217_s9, 1024  ;;  %s878_s1 = scalar_lea.hbm %s1275_s3, 2048 }
 0x161   : > { %p875_p2 = scmp.ne.s32.totalorder %s1217_s9, %s874_s20  ;;  %p879_p7 = scmp.lt.u32.totalorder %s1217_s9, %s1275_s3 }
 0x162   : > { %p880_p3 = scmp.lt.u32.totalorder %s878_s1, %s874_s20  ;;  %p882_p4 = scmp.lt.u32.totalorder %s874_s20, %s1217_s9 }
 0x163   : > { %p876_p11 = pnand %p875_p2, %p1297_p10 }
 0x164   : > { %p881_p0 = por %p880_p3, %p879_p7 }
 0x165   : > { %p877_p5 = pneg %p876_p11 }
 0x166   : > { %p883_p12 = por %p882_p4, %p881_p0 }
 0x168   : > { %p884_p1 = pnand %p883_p12, %p877_p5 }
 0x16a   : > { %887 = shalt.err (!%p884_p1)
}
 0x16b   : > { %s954_s19 = smov 128   ;;  %s955_s23 = smov 8  }
 0x16c   : > { %700 = dma.vmem_to_hbm [thread:$0]  (%p1297_p10), %s1219_s22, 1024, %s1217_s9, %s497_s8, %s954_s19, %s954_s19, %s955_s23  }
 0x16d PF: > { %s527_s18 = sand.u32 1, %s926_s12   ;;  %p1298_p8 = scmp.ne.s32.totalorder %s1286_s27, 0 }
 0x16e   : > { %p1299_p9 = scmp.ge.s32.totalorder %s946_s17, 2  ;;  %s528_s24 = scalar_lea.sflag [#allocation4], %s527_s18 }
 0x170   : > { %p713_p6 = pnand %p1299_p9, %p1298_p8 }
 0x172   : > { %921 = dma.done.wait (!%p713_p6), %s528_s24, 1024  }
 0x173   : > { %923 = vsyncadd (!%p713_p6), %s528_s24, 4294966272  ;;  %s22_s17 = sadd.s32 1, %s946_s17   ;;  %s1300_s25 = sld [smem:[#allocation12_spill]] }
 0x174   : > { %p19_p13 = scmp.ge.s32.totalorder %s22_s17, 4   ;;  %s1301_s12 = smov %s930_s13 }
 0x175   : > { %s1302_s13 = smov %s934_s14  ;;  %s1303_s14 = smov %s1036_s26 }
 0x176   : > { %s1304_s15 = smov %s942_s16  ;;  %21 = sbr.rel (!%p19_p13) target bundleno = 11 (0xb), region = 101 }
 0x179   : > { %s1305_s16 = smov %s1300_s25 }
 0x17d   :  { %533 = vsyncpa [#allocation3], 1 }
 0x17e   :  { %535 = vsyncpa [#allocation3 + $0x1], 1 }
 0x17f   :  { %536 = vsyncpa [#allocation6], 1 }
 0x180   :  { %538 = vsyncpa [#allocation6 + $0x1], 1 }
 0x181   :  { %539 = vsyncpa [#allocation4], 1 }
 0x182   :  { %541 = vsyncpa [#allocation4 + $0x1], 1 }

</bundles_post_ra>
